<compile_context>
chip_gen: v5e
topology: v5e:2x2
jax: 0.10.0
libtpu: 0.0.40
codegen_flags: <defaults>
</compile_context>

<pallas_src>
import numpy as np

import jax
import jax.numpy as jnp
from jax.experimental import pallas as pl
from jax.experimental.pallas import tpu as pltpu


# ---------------------------------------------------------------------------
# Linear (nn.Linear) kernel: y = x @ W + b, row-tiled
# ---------------------------------------------------------------------------
def _linear_kernel(x_ref, w_ref, b_ref, o_ref):
    x = x_ref[...].astype(jnp.bfloat16)
    y = jnp.dot(x, w_ref[...], preferred_element_type=jnp.float32) + b_ref[...]
    o_ref[...] = y.astype(o_ref.dtype)


def _pick_row_tile(n, target=256):
    if n <= target:
        return n
    for t in range(target, 7, -1):
        if n % t == 0 and t % 8 == 0:
            return t
    return n


def linear(x, w_bf16, b, out_dtype=jnp.float32):
    n, k = x.shape
    k2, m = w_bf16.shape
    assert k == k2
    tm = _pick_row_tile(n)
    return pl.pallas_call(
        _linear_kernel,
        out_shape=jax.ShapeDtypeStruct((n, m), out_dtype),
        grid=(n // tm,),
        in_specs=[
            pl.BlockSpec((tm, k), lambda i: (i, 0)),
            pl.BlockSpec((k, m), lambda i: (0, 0)),
            pl.BlockSpec((1, m), lambda i: (0, 0)),
        ],
        out_specs=pl.BlockSpec((tm, m), lambda i: (i, 0)),
        compiler_params=pltpu.CompilerParams(
            dimension_semantics=("parallel",),
            vmem_limit_bytes=32 * 1024 * 1024,
        ),
    )(x, w_bf16, b.reshape(1, m).astype(jnp.float32))


# ---------------------------------------------------------------------------
# LLaMA-style decoder stack kernel: grid = (env_block, layer)
# ---------------------------------------------------------------------------
def _rms_norm(x, gamma, eps=1e-6):
    var = jnp.mean(x * x, axis=-1, keepdims=True)
    return x * jax.lax.rsqrt(var + eps) * gamma


def make_stack_kernel(n_heads, head_dim, b_env, seq_len):
    hd = head_dim
    s = seq_len
    neg = -1e9

    def kernel(x_ref, mask_ref, cos_ref, sin_ref, rot_ref,
               attn_g_ref, wq_ref, wk_ref, wv_ref, wo_ref,
               mlp_g_ref, wg_ref, wu_ref, wd_ref, final_g_ref,
               o_ref, h_acc):
        layer = pl.program_id(1)
        n_layers = pl.num_programs(1)

        # residual stream lives in VMEM scratch across the layer axis
        @pl.when(layer == 0)
        def _():
            h_acc[...] = x_ref[0].astype(jnp.float32)

        h = h_acc[...]                       # (M, E) f32,  M = b_env * s
        cos = cos_ref[...]                   # (M, E) f32
        sin = sin_ref[...]
        rot = rot_ref[...]                   # (E, E) bf16 block-diagonal rotate-half

        # --- additive attention bias rebuilt in-kernel (no (S,S) HBM tensor) ---
        m = mask_ref[0]                      # (B_env, S) f32 step mask
        qi = jax.lax.broadcasted_iota(jnp.int32, (b_env, s, s), 1)
        ki = jax.lax.broadcasted_iota(jnp.int32, (b_env, s, s), 2)
        keep = (qi >= ki) & (m[:, None, :] > 0.0)
        bias = jnp.where(keep, 0.0, neg).astype(jnp.float32)   # (B_env, S, S)

        # ---- self-attention block ----
        hn = _rms_norm(h, attn_g_ref[0]).astype(jnp.bfloat16)
        q = jnp.dot(hn, wq_ref[0], preferred_element_type=jnp.float32)   # scale folded into Wq
        k = jnp.dot(hn, wk_ref[0], preferred_element_type=jnp.float32)
        v = jnp.dot(hn, wv_ref[0], preferred_element_type=jnp.float32)

        # RoPE: q*cos + rotate_half(q)*sin, rotate_half done as one MXU matmul
        q = q * cos + jnp.dot(q.astype(jnp.bfloat16), rot,
                              preferred_element_type=jnp.float32) * sin
        k = k * cos + jnp.dot(k.astype(jnp.bfloat16), rot,
                              preferred_element_type=jnp.float32) * sin

        q3 = q.reshape(b_env, s, -1).astype(jnp.bfloat16)    # (B_env, S, E)
        k3 = k.reshape(b_env, s, -1).astype(jnp.bfloat16)
        v3 = v.reshape(b_env, s, -1).astype(jnp.bfloat16)

        attn_out = None
        for hh in range(n_heads):
            sl = slice(hh * hd, (hh + 1) * hd)
            sc = jnp.einsum('bqd,bkd->bqk', q3[:, :, sl], k3[:, :, sl],
                            preferred_element_type=jnp.float32) + bias
            sc = sc - jnp.max(sc, axis=-1, keepdims=True)
            p = jnp.exp(sc)
            p = p * pl.reciprocal(jnp.sum(p, axis=-1, keepdims=True), approx=True)
            ctx = jnp.einsum('bqk,bkd->bqd', p.astype(jnp.bfloat16), v3[:, :, sl],
                             preferred_element_type=jnp.float32)        # (B_env, S, hd)
            ctx2 = ctx.reshape(b_env * s, hd).astype(jnp.bfloat16)
            contrib = jnp.dot(ctx2, wo_ref[0, sl, :],
                              preferred_element_type=jnp.float32)       # (M, E)
            attn_out = contrib if attn_out is None else attn_out + contrib
        h = h + attn_out

        # ---- SwiGLU MLP block (silu activation) ----
        hn = _rms_norm(h, mlp_g_ref[0]).astype(jnp.bfloat16)
        g = jnp.dot(hn, wg_ref[0], preferred_element_type=jnp.float32)
        u = jnp.dot(hn, wu_ref[0], preferred_element_type=jnp.float32)
        act = (g * jax.nn.sigmoid(g)) * u
        h = h + jnp.dot(act.astype(jnp.bfloat16), wd_ref[0],
                        preferred_element_type=jnp.float32)

        h_acc[...] = h

        @pl.when(layer == n_layers - 1)
        def _():
            o_ref[0] = _rms_norm(h, final_g_ref[...]).astype(o_ref.dtype)

    return kernel


def llama_stack_forward(x, masks3, cos_me, sin_me, rot, p, n_heads, head_dim):
    n_blocks, m_rows, e = x.shape
    l = p["wq"].shape[0]
    hmlp = p["wg"].shape[-1]
    b_env = masks3.shape[1]
    s = masks3.shape[2]
    kernel = make_stack_kernel(n_heads, head_dim, b_env, s)
    return pl.pallas_call(
        kernel,
        out_shape=jax.ShapeDtypeStruct((n_blocks, m_rows, e), jnp.bfloat16),
        grid=(n_blocks, l),
        in_specs=[
            pl.BlockSpec((1, m_rows, e), lambda b, li: (b, 0, 0)),     # x
            pl.BlockSpec((1, b_env, s), lambda b, li: (b, 0, 0)),      # step masks
            pl.BlockSpec((m_rows, e), lambda b, li: (0, 0)),           # cos table
            pl.BlockSpec((m_rows, e), lambda b, li: (0, 0)),           # sin table
            pl.BlockSpec((e, e), lambda b, li: (0, 0)),                # rotate-half matrix
            pl.BlockSpec((1, 1, e), lambda b, li: (li, 0, 0)),         # attn rmsnorm gamma
            pl.BlockSpec((1, e, e), lambda b, li: (li, 0, 0)),         # Wq (per-layer stream)
            pl.BlockSpec((1, e, e), lambda b, li: (li, 0, 0)),         # Wk
            pl.BlockSpec((1, e, e), lambda b, li: (li, 0, 0)),         # Wv
            pl.BlockSpec((1, e, e), lambda b, li: (li, 0, 0)),         # Wo
            pl.BlockSpec((1, 1, e), lambda b, li: (li, 0, 0)),         # mlp rmsnorm gamma
            pl.BlockSpec((1, e, hmlp), lambda b, li: (li, 0, 0)),      # W_gate
            pl.BlockSpec((1, e, hmlp), lambda b, li: (li, 0, 0)),      # W_up
            pl.BlockSpec((1, hmlp, e), lambda b, li: (li, 0, 0)),      # W_down
            pl.BlockSpec((1, e), lambda b, li: (0, 0)),                # final rmsnorm gamma
        ],
        out_specs=pl.BlockSpec((1, m_rows, e), lambda b, li: (b, 0, 0)),
        scratch_shapes=[pltpu.VMEM((m_rows, e), jnp.float32)],
        compiler_params=pltpu.CompilerParams(
            dimension_semantics=("parallel", "arbitrary"),
            vmem_limit_bytes=64 * 1024 * 1024,
        ),
    )(
        x, masks3, cos_me, sin_me, rot,
        p["attn_norm"], p["wq"], p["wk"], p["wv"], p["wo"],
        p["mlp_norm"], p["wg"], p["wu"], p["wd"], p["final_norm"],
    )


# ---------------------------------------------------------------------------
# Parameter prep (bf16 storage, scale folding, norm reshape)
# ---------------------------------------------------------------------------
def _rotate_half_matrix(n_heads, head_dim):
    hd = head_dim
    half = hd // 2
    e = n_heads * hd
    r = np.zeros((e, e), np.float32)
    for h in range(n_heads):
        o = h * hd
        for i in range(half):
            r[o + i + half, o + i] = -1.0   # first half:  -x[j+hd/2]
            r[o + i, o + i + half] = 1.0    # second half:  x[j-hd/2]
    return jnp.asarray(r, dtype=jnp.bfloat16)


def prepare_params(p, head_dim):
    l, e, _ = p["wq"].shape
    scale = 1.0 / (head_dim ** 0.5)
    bf = jnp.bfloat16
    return {
        "w_proj": p["w_proj"].astype(bf), "b_proj": p["b_proj"].astype(jnp.float32),
        "w_out": p["w_out"].astype(bf),   "b_out": p["b_out"].astype(jnp.float32),
        "attn_norm": p["attn_norm"].reshape(l, 1, e).astype(jnp.float32),
        "mlp_norm": p["mlp_norm"].reshape(l, 1, e).astype(jnp.float32),
        "final_norm": p["final_norm"].astype(jnp.float32),
        "wq": (p["wq"] * scale).astype(bf),   # 1/sqrt(head_dim) folded into Wq
        "wk": p["wk"].astype(bf), "wv": p["wv"].astype(bf), "wo": p["wo"].astype(bf),
        "wg": p["wg"].astype(bf), "wu": p["wu"].astype(bf), "wd": p["wd"].astype(bf),
    }


def _choose_env_block(n_envs, seq_len, target_rows=512):
    best = 1
    for b in range(1, n_envs + 1):
        if n_envs % b == 0 and b * seq_len <= target_rows:
            best = b
    return best


# ---------------------------------------------------------------------------
# Wrapper-level forward (mirrors TransformerWrapper.forward, llamarl branch,
# rnn_build_seq_info given, no stop_grad_steps / sink tokens).
# ---------------------------------------------------------------------------
def transformer_wrapper_forward(feats, masks, n_envs, seq_len, params, n_heads, head_dim):
    e = params["w_proj"].shape[-1]
    s = seq_len
    p = prepare_params(params, head_dim)

    b_env = _choose_env_block(n_envs, s)
    n_blocks = n_envs // b_env
    m_rows = b_env * s

    # feats_proj (nn.Linear input_size -> n_embed), bf16 activations out
    h = linear(feats, p["w_proj"], p["b_proj"], out_dtype=jnp.bfloat16)   # (N, E)
    h = h.reshape(n_blocks, m_rows, e)

    # Step masks only; causal + step attention bias is rebuilt inside the kernel.
    # TODO(synk): LlamaRLModel's exact episode-reset / banded / sink-KV attention logic is
    # not public; we replicate standard causal + HF-style attention_mask semantics.
    masks3 = masks.reshape(n_blocks, b_env, s).astype(jnp.float32)

    # Rotary embedding tables (position_embed_type='rope'), tiled to full width and
    # repeated per env within a block (positions reset per env).
    inv_freq = 1.0 / (10000.0 ** (jnp.arange(0, head_dim, 2, dtype=jnp.float32) / head_dim))
    pos = jnp.arange(s, dtype=jnp.float32)
    freqs = pos[:, None] * inv_freq[None, :]
    emb = jnp.concatenate([freqs, freqs], axis=-1)                  # (S, head_dim)
    cos_full = jnp.tile(jnp.cos(emb), (1, n_heads))                 # (S, E)
    sin_full = jnp.tile(jnp.sin(emb), (1, n_heads))
    cos_me = jnp.tile(cos_full, (b_env, 1))                         # (M, E)
    sin_me = jnp.tile(sin_full, (b_env, 1))

    rot = _rotate_half_matrix(n_heads, head_dim)                    # (E, E) bf16

    h = llama_stack_forward(h, masks3, cos_me, sin_me, rot, p, n_heads, head_dim)

    # feats_out (nn.Linear n_embed -> n_embed), then flatten(0, 1)
    h = h.reshape(n_envs * s, e)
    out = linear(h, p["w_out"], p["b_out"], out_dtype=jnp.float32)

    # TODO(synk): past_key_values stacking / cache postprocessing is bookkeeping around the
    # HF model cache object; not represented in this synthetic kernel (returned as None).
    return out, None


# ---------------------------------------------------------------------------
# Deterministic parameter construction (PyTorch-like f32 init)
# ---------------------------------------------------------------------------
def make_params(key, input_size, n_embed, n_mlp_hidden, n_layers):
    ks = jax.random.split(key, 12)
    scale = 0.02
    return {
        "w_proj": scale * jax.random.normal(ks[0], (input_size, n_embed), jnp.float32),
        "b_proj": scale * jax.random.normal(ks[1], (n_embed,), jnp.float32),
        "w_out": scale * jax.random.normal(ks[2], (n_embed, n_embed), jnp.float32),
        "b_out": scale * jax.random.normal(ks[3], (n_embed,), jnp.float32),
        "attn_norm": jnp.ones((n_layers, n_embed), jnp.float32),
        "mlp_norm": jnp.ones((n_layers, n_embed), jnp.float32),
        "final_norm": jnp.ones((1, n_embed), jnp.float32),
        "wq": scale * jax.random.normal(ks[4], (n_layers, n_embed, n_embed), jnp.float32),
        "wk": scale * jax.random.normal(ks[5], (n_layers, n_embed, n_embed), jnp.float32),
        "wv": scale * jax.random.normal(ks[6], (n_layers, n_embed, n_embed), jnp.float32),
        "wo": scale * jax.random.normal(ks[7], (n_layers, n_embed, n_embed), jnp.float32),
        "wg": scale * jax.random.normal(ks[8], (n_layers, n_embed, n_mlp_hidden), jnp.float32),
        "wu": scale * jax.random.normal(ks[9], (n_layers, n_embed, n_mlp_hidden), jnp.float32),
        "wd": scale * jax.random.normal(ks[10], (n_layers, n_mlp_hidden, n_embed), jnp.float32),
    }


if __name__ == "__main__":
    # Small config consistent with the module's __init__ / forward
    n_envs = 2
    seq_len = 8
    input_size = 16
    n_embed = 32          # config.n_hidden
    n_mlp_hidden = 64     # config.n_mlp_hidden
    n_layers = 2          # config.n_layers
    n_heads = 4           # config.n_heads
    head_dim = n_embed // n_heads

    key = jax.random.PRNGKey(0)
    k_feat, k_mask, k_par = jax.random.split(key, 3)

    # PyTorch-style inputs: feats [n_envs*seq_len, input_size], masks [n_envs*seq_len, 1]
    feats = jax.random.normal(k_feat, (n_envs * seq_len, input_size), jnp.float32)
    masks = (jax.random.uniform(k_mask, (n_envs * seq_len, 1)) > 0.1).astype(jnp.float32)

    params = make_params(k_par, input_size, n_embed, n_mlp_hidden, n_layers)

    out, _ = transformer_wrapper_forward(
        feats, masks, n_envs, seq_len, params, n_heads, head_dim
    )
    out = jax.block_until_ready(out)
    assert out.shape == (n_envs * seq_len, n_embed)
    assert bool(jnp.all(jnp.isfinite(out)))
    print("KERNEL_OK")
</pallas_src>

<mosaic_0001>
module attributes {stable_mosaic.version = 11 : i64} {
  func.func @_linear_kernel(%arg0: i32, %arg1: memref<16x16xf32, #tpu.memory_space<vmem>>, %arg2: memref<16x32xbf16, #tpu.memory_space<vmem>>, %arg3: memref<1x32xf32, #tpu.memory_space<vmem>>, %arg4: memref<16x32xbf16, #tpu.memory_space<vmem>>) attributes {dimension_semantics = [#tpu.dimension_semantics<parallel>], iteration_bounds = array<i64: 1>, scalar_prefetch = 0 : i64, scratch_operands = 0 : i64, tpu.core_type = #tpu.core_type<tc>, window_params = [{transform_indices = @transform_0, window_bounds = array<i64: 16, 16>}, {pipeline_mode = #tpu.pipeline_mode<synchronous>, transform_indices = @transform_1, window_bounds = array<i64: 16, 32>}, {pipeline_mode = #tpu.pipeline_mode<synchronous>, transform_indices = @transform_2, window_bounds = array<i64: 1, 32>}, {transform_indices = @transform_3, window_bounds = array<i64: 16, 32>}]} {
    %c0 = arith.constant 0 : index
    %c0_0 = arith.constant 0 : index
    %0 = vector.load %arg1[%c0, %c0_0] : memref<16x16xf32, #tpu.memory_space<vmem>>, vector<16x16xf32>
    %1 = arith.truncf %0 : vector<16x16xf32> to vector<16x16xbf16>
    %c0_1 = arith.constant 0 : index
    %c0_2 = arith.constant 0 : index
    %2 = vector.load %arg2[%c0_1, %c0_2] : memref<16x32xbf16, #tpu.memory_space<vmem>>, vector<16x32xbf16>
    %cst = arith.constant dense<0.000000e+00> : vector<16x32xf32>
    %3 = tpu.matmul %1, %2, %cst {dimension_numbers = #tpu.dot_dimension_numbers<[1], [0], [0], [1], [0, 0, 1, 1], [], []>} : vector<16x16xbf16>, vector<16x32xbf16>, vector<16x32xf32> -> vector<16x32xf32>
    %c0_3 = arith.constant 0 : index
    %c0_4 = arith.constant 0 : index
    %4 = vector.load %arg3[%c0_3, %c0_4] : memref<1x32xf32, #tpu.memory_space<vmem>>, vector<1x32xf32>
    %5 = vector.broadcast %4 : vector<1x32xf32> to vector<16x32xf32>
    %6 = arith.addf %3, %5 : vector<16x32xf32>
    %7 = arith.truncf %6 : vector<16x32xf32> to vector<16x32xbf16>
    %c0_5 = arith.constant 0 : index
    %c0_6 = arith.constant 0 : index
    %8 = vector.load %arg4[%c0_5, %c0_6] : memref<16x32xbf16, #tpu.memory_space<vmem>>, vector<16x32xbf16>
    tpu.vector_store %arg4[%c0_5, %c0_6], %7 {strides = array<i32>} : memref<16x32xbf16, #tpu.memory_space<vmem>>, vector<16x32xbf16>,
    return
  }
  func.func @transform_0(%arg0: i32) -> (i32, i32) {
    %c0_i32 = arith.constant 0 : i32
    %c0_i32_0 = arith.constant 0 : i32
    return %arg0, %c0_i32 : i32, i32
  }
  func.func @transform_1(%arg0: i32) -> (i32, i32) {
    %c0_i32 = arith.constant 0 : i32
    %c0_i32_0 = arith.constant 0 : i32
    %c0_i32_1 = arith.constant 0 : i32
    return %c0_i32, %c0_i32_0 : i32, i32
  }
  func.func @transform_2(%arg0: i32) -> (i32, i32) {
    %c0_i32 = arith.constant 0 : i32
    %c0_i32_0 = arith.constant 0 : i32
    %c0_i32_1 = arith.constant 0 : i32
    return %c0_i32, %c0_i32_0 : i32, i32
  }
  func.func @transform_3(%arg0: i32) -> (i32, i32) {
    %c0_i32 = arith.constant 0 : i32
    %c0_i32_0 = arith.constant 0 : i32
    return %arg0, %c0_i32 : i32, i32
  }
}

</mosaic_0001>

<bundles_post_ra>
// kernel: tpu_custom_call.1
= control target key start
LH: loop header
LB: loop body
LE: loop exit
PB: predicated region body
PF: predicated region fallthrough
CT: control target
= control target key end

     0   :  { %8 = vsyncpa [#allocation3], 0  ;;  %s243_s0 = inlined_call_operand.hbm [shape: f32[16,16], index: 0, kind: input, shape index: {}]   ;;  %s244_s1 = inlined_call_operand.hbm [shape: bf16[16,32], index: 1, kind: input, shape index: {}]   ;;  %s245_s2 = inlined_call_operand.vmem [shape: f32[1,32], index: 2, kind: input, shape index: {}]   ;;  %s246_s3 = inlined_call_operand.hbm [shape: bf16[16,32], index: 3, kind: output, shape index: {}]  }
   0x1   :  { %9 = vsyncpa [#allocation6], 0 }
   0x2   :  { %10 = vsyncpa [#allocation4], 0  ;;  %s15_s14 = sshll.u32 %s243_s0, 4  ;;  %s198_s15 = smov [#allocation2]   ;;  %s16_s14 = int_to_ptr.hbm [resolvable:$true] %s15_s14 }
   0x3   :  { %s17_s16 = sshll.u32 %s198_s15, 4  ;;  %s28_s19 = sshll.u32 %s244_s1, 4  ;;  %s18_s16 = int_to_ptr.vmem [resolvable:$true] %s17_s16  ;;  %s29_s19 = int_to_ptr.hbm [resolvable:$true] %s28_s19 }
   0x4   :  { %s199_s20 = smov 128   ;;  %s200_s21 = smov 8  }
   0x5   :  { %23 = dma.hbm_to_vmem [thread:$0]  %s16_s14, 256, %s18_s16, [#allocation3], %s199_s20, %s199_s20, %s200_s21  }
   0x6   :  { %s201_s22 = smov [#allocation5]   ;;  %s202_s24 = smov 64  }
   0x7   :  { %s30_s23 = sshll.u32 %s201_s22, 4  ;;  %s203_s25 = smov 4   ;;  %s31_s23 = int_to_ptr.vmem [resolvable:$true] %s30_s23 }
   0x8   :  { %36 = dma.hbm_to_vmem [thread:$0]  %s29_s19, 128, %s31_s23, [#allocation6], %s202_s24, %s202_s24, %s203_s25  }
   0x9   :  { %192 = dma.done.wait [#allocation3], 256  }
   0xa   :  { %193 = vsyncadd [#allocation3], 4294967040 }
   0xb   :  { %194 = dma.done.wait [#allocation6], 128  }
   0xc   :  { %195 = vsyncadd [#allocation6], 4294967168  ;;  %v111_v0 = vld [vmem:[#allocation5] sm:$0xff]  ;;  %v48_v1 = vld [vmem:[#allocation2] sm:$0xff]  ;;  %vm63_vm0 = vcmask 130048   ;;  %vm83_vm1 = vcmask 257024  }
   0xd   :  { %v49_v2 = vld [vmem:[#allocation2 + $0x8] sm:$0xff]  ;;  %74 = vmatpush.bf16.msra.mxu0 %v111_v0  ;;  %v119_v4 = vld [vmem:[%s245_s2] ss:$0 sm:$0xff]  ;;  %s204_s26 = smov [#allocation7]   ;;  %s92_s30 = sshll.u32 %s246_s3, 4  ;;  %s93_s30 = int_to_ptr.hbm [resolvable:$true] %s92_s30 }
   0xe   :  { %v50_v3 = vpack.c.bf16 %v49_v2, %v48_v1  ;;  %s90_s27 = sshll.u32 %s204_s26, 4  ;;  %s91_s27 = int_to_ptr.vmem [resolvable:$true] %s90_s27 }
  0x10   :  { %110 = vmatmul.msk.bf16.vlgmr.msra.gmra.mxu0 %vm63_vm0, %v50_v3 }
  0x8d   :  { %v76_v5 = vpop.f32.mrf.mxu0 }
  0x8e   :  { %v77_v6 = vadd.f32 %v119_v4, %v76_v5 }
  0x90   :  { %v81_v7 = vpack.c.bf16 %v77_v6, %v77_v6 }
  0x92   :  { %84 = vst.msk [vmem:[#allocation7] sm:$0xf] %vm83_vm1, %v81_v7 }
  0x95   :  { %v78_v8 = vpop.f32.mrf.mxu0 }
  0x96   :  { %v79_v9 = vadd.f32 %v119_v4, %v78_v8 }
  0x98   :  { %v82_v10 = vpack.c.bf16 %v79_v9, %v79_v9 }
  0x9a   :  { %85 = vst.msk [vmem:[#allocation7 + $0x4] sm:$0xf] %vm83_vm1, %v82_v10 }
  0x9b   :  { %98 = dma.vmem_to_hbm [thread:$0]  %s91_s27, 128, %s93_s30, [#allocation4], %s202_s24, %s202_s24, %s203_s25  }
  0x9c   :  { %196 = dma.done.wait [#allocation4], 128  }
  0x9d   :  { %197 = vsyncadd [#allocation4], 4294967168 }
  0x9e   :  { %103 = vsyncpa [#allocation3], 1 }
  0x9f   :  { %104 = vsyncpa [#allocation6], 1 }
  0xa0   :  { %105 = vsyncpa [#allocation4], 1 }

</bundles_post_ra>
